<compile_context>
chip_gen: v6e
topology: v6e:2x2x1
jax: 0.10.0
libtpu: 0.0.40
codegen_flags: <defaults>
</compile_context>

<pallas_src>
import math

import jax
import jax.numpy as jnp
from jax.experimental import pallas as pl
from jax.experimental.pallas import tpu as pltpu


def _pe_add_kernel(x_ref, pe_ref, o_ref):
    # x_ref / o_ref : (TR, TC) tile of the flattened (B, L*D) activation slab.
    # pe_ref        : (1, TC)  matching slice of the flattened PE row
    #                 (already in x.dtype; broadcast over the TR rows).
    o_ref[...] = x_ref[...] + pe_ref[...]


def make_position_encoding_table(n_filters: int = 128, max_len: int = 500,
                                 dtype=jnp.float32) -> jnp.ndarray:
    """Deterministic buffer init, identical to the PyTorch __init__."""
    position = jnp.arange(0, max_len, dtype=jnp.float32)[:, None]          # (max_len, 1)
    div_term = jnp.exp(jnp.arange(0, n_filters, 2, dtype=jnp.float32)
                       * -(math.log(10000.0) / n_filters))                 # (n_filters//2,)
    angles = position * div_term                                           # (max_len, n_filters//2)
    pe = jnp.zeros((max_len, n_filters), dtype=jnp.float32)
    pe = pe.at[:, 0::2].set(jnp.sin(angles))
    pe = pe.at[:, 1::2].set(jnp.cos(angles))
    return pe.astype(dtype)


def _hw_budgets():
    """Generation-aware (block_bytes, vmem_limit_bytes)."""
    block = 2 * 1024 * 1024          # v5e/v6e: ~2 MiB blocks are already at roofline
    vmem_limit = 32 * 1024 * 1024    # overrides v5e's 16 MiB default scoped limit
    try:
        kind = jax.devices()[0].device_kind.lower()
    except Exception:
        kind = ""
    if ("v7" in kind) or ("tpu7" in kind) or ("7x" in kind):
        # v7x: ~3.2 TB/s per TC -> bigger blocks to amortize per-step overhead;
        # 4 x 6 MiB double-buffered blocks still fit 64 MiB physical VMEM easily.
        block = 6 * 1024 * 1024
        vmem_limit = 48 * 1024 * 1024
    return block, vmem_limit


def _choose_tiles(B: int, C: int, itemsize: int, block_bytes: int,
                  vmem_limit_bytes: int):
    """Pick (TR, TC) obeying the (8,128)/full-extent rule within the VMEM budget."""
    # Packed-sublane multiple for the dtype: 8 (f32), 16 (bf16), 32 (int8/fp8).
    sub = max(8, 32 // max(itemsize, 1))

    # Per-step VMEM cost with double buffering ~= 2*(x_in + out) + 2*pe blocks,
    # i.e. <= ~5x the x block bytes. Clamp the budget so a step always fits.
    max_x_block = max(vmem_limit_bytes // 5, 128 * sub * itemsize)
    block_bytes = max(min(block_bytes, max_x_block), 1)

    row_bytes = C * itemsize
    rows_fit = block_bytes // max(row_bytes, 1)

    if rows_fit >= sub:
        # Row-tiled path: full lane extent (fused L*D), sub-multiple row tiles.
        TC = C
        TR = (rows_fit // sub) * sub
        # Keep >= ~4 row-grid steps on large slabs (megacore sharding on v7x
        # plus DMA/compute overlap) instead of collapsing to a (1,) grid.
        if B * row_bytes > 4 * block_bytes and B >= 4 * sub:
            cap = (pl.cdiv(B, 4) // sub) * sub
            if cap >= sub:
                TR = min(TR, cap)
        if TR >= B:
            TR = B                     # full extent -> no divisibility requirement
    else:
        # A single fused row exceeds the budget (or nearly does): keep `sub`
        # rows and tile the lane axis in multiples of 128. (This also catches
        # the old 8x-budget overshoot when 1 <= rows_fit < sub.)
        TR = B if B < sub else sub
        TC = (block_bytes // max(TR * itemsize, 1)) // 128 * 128
        TC = max(128, TC)
        if TC >= C:
            TC = C
    return TR, TC


def position_encoding_forward(x: jnp.ndarray, pe: jnp.ndarray,
                              *, block_bytes: int | None = None) -> jnp.ndarray:
    """
    x : (*, L, D)  -> (*, L, D), with pe[:L, :] added (broadcast over leading dims).
    pe: (max_len, D) precomputed sinusoidal table.
    """
    *lead, L, D = x.shape
    assert D == pe.shape[1], "hidden size mismatch with n_filters"
    assert L <= pe.shape[0], "sequence longer than max_len"

    B = 1
    for d in lead:
        B *= d
    C = L * D

    default_block, vmem_limit = _hw_budgets()
    if block_bytes is None:
        block_bytes = default_block

    # One-time cast + flatten of the PE slab in the wrapper (not per grid step).
    # Note: like the module's common f32 use this adds in x.dtype; PyTorch would
    # promote mixed dtypes to f32 — acceptable precision trade for bf16 inputs.
    pe_row = pe[:L, :].astype(x.dtype).reshape(1, C)
    x2 = x.reshape(B, C)

    itemsize = jnp.dtype(x.dtype).itemsize
    TR, TC = _choose_tiles(B, C, itemsize, block_bytes, vmem_limit)

    cost = pl.CostEstimate(flops=B * C, transcendentals=0,
                           bytes_accessed=2 * B * C * itemsize + C * itemsize)

    if TC == C:
        # Common path: single column block; pe block index constant -> fetched once.
        grid = (pl.cdiv(B, TR),)
        in_specs = [pl.BlockSpec((TR, TC), lambda r: (r, 0)),   # x tile
                    pl.BlockSpec((1, TC), lambda r: (0, 0))]    # pe row (resident)
        out_specs = pl.BlockSpec((TR, TC), lambda r: (r, 0))
        dim_sem = ("parallel",)
    else:
        # Lane-tiled path: column axis outer, row axis inner so the pe block
        # index (0, c) is constant across consecutive steps -> Pallas skips
        # the redundant pe copy.
        grid = (pl.cdiv(C, TC), pl.cdiv(B, TR))
        in_specs = [pl.BlockSpec((TR, TC), lambda c, r: (r, c)),
                    pl.BlockSpec((1, TC), lambda c, r: (0, c))]
        out_specs = pl.BlockSpec((TR, TC), lambda c, r: (r, c))
        dim_sem = ("parallel", "parallel")

    out2 = pl.pallas_call(
        _pe_add_kernel,
        out_shape=jax.ShapeDtypeStruct((B, C), x.dtype),
        grid_spec=pl.GridSpec(grid=grid, in_specs=in_specs, out_specs=out_specs),
        input_output_aliases={0: 0},     # output has x's shape/dtype; halves peak HBM footprint
        cost_estimate=cost,
        compiler_params=pltpu.CompilerParams(
            dimension_semantics=dim_sem,
            vmem_limit_bytes=vmem_limit,
        ),
    )(x2, pe_row)

    return out2.reshape(x.shape)


if __name__ == "__main__":
    n_filters = 32
    max_len = 64
    pe = make_position_encoding_table(n_filters=n_filters, max_len=max_len)

    key = jax.random.PRNGKey(0)
    k1, k2, k3 = jax.random.split(key, 3)

    # References are computed BEFORE the kernel calls (inputs may be aliased/donated).

    # 1) 4-D input (2, 4, 8, 32): leading-dim broadcast path, single-block grid.
    x1 = jax.random.normal(k1, (2, 4, 8, n_filters), dtype=jnp.float32)
    ref1 = x1 + pe[:8, :][None, None, :, :]
    out1 = jax.block_until_ready(position_encoding_forward(x1, pe))
    assert out1.shape == (2, 4, 8, n_filters)
    assert jnp.allclose(out1, ref1, atol=1e-6), "mismatch vs reference (4-D)"

    # 2) 3-D input (3, 10, 32): classic (batch, seq, hidden) case.
    x2 = jax.random.normal(k2, (3, 10, n_filters), dtype=jnp.float32)
    ref2 = x2 + pe[:10, :][None, :, :]
    out2 = jax.block_until_ready(position_encoding_forward(x2, pe))
    assert out2.shape == (3, 10, n_filters)
    assert jnp.allclose(out2, ref2, atol=1e-6), "mismatch vs reference (3-D)"

    # 3) Tiny block budget to exercise the lane-tiled branch, multi-block grid,
    #    pe residency across inner row steps, and non-divisible tail masking.
    x3 = jax.random.normal(k3, (5, 3, 9, n_filters), dtype=jnp.float32)
    ref3 = x3 + pe[:9, :][None, None, :, :]
    out3 = jax.block_until_ready(position_encoding_forward(x3, pe, block_bytes=1024))
    assert out3.shape == (5, 3, 9, n_filters)
    assert jnp.allclose(out3, ref3, atol=1e-6), "mismatch vs reference (tiled tails)"

    print("KERNEL_OK")
</pallas_src>

<mosaic_0001>
module attributes {stable_mosaic.version = 11 : i64} {
  func.func @_pe_add_kernel(%arg0: i32, %arg1: memref<8x256xf32, #tpu.memory_space<vmem>>, %arg2: memref<1x256xf32, #tpu.memory_space<vmem>>, %arg3: memref<8x256xf32, #tpu.memory_space<vmem>>) attributes {dimension_semantics = [#tpu.dimension_semantics<parallel>], iteration_bounds = array<i64: 1>, scalar_prefetch = 0 : i64, scratch_operands = 0 : i64, tpu.core_type = #tpu.core_type<tc>, window_params = [{transform_indices = @transform_0, window_bounds = array<i64: 8, 256>}, {pipeline_mode = #tpu.pipeline_mode<synchronous>, transform_indices = @transform_1, window_bounds = array<i64: 1, 256>}, {transform_indices = @transform_2, window_bounds = array<i64: 8, 256>}]} {
    %c0 = arith.constant 0 : index
    %c0_0 = arith.constant 0 : index
    %0 = vector.load %arg1[%c0, %c0_0] : memref<8x256xf32, #tpu.memory_space<vmem>>, vector<8x256xf32>
    %c0_1 = arith.constant 0 : index
    %c0_2 = arith.constant 0 : index
    %1 = vector.load %arg2[%c0_1, %c0_2] : memref<1x256xf32, #tpu.memory_space<vmem>>, vector<1x256xf32>
    %2 = vector.broadcast %1 : vector<1x256xf32> to vector<8x256xf32>
    %3 = arith.addf %0, %2 : vector<8x256xf32>
    %c0_3 = arith.constant 0 : index
    %c0_4 = arith.constant 0 : index
    %4 = vector.load %arg3[%c0_3, %c0_4] : memref<8x256xf32, #tpu.memory_space<vmem>>, vector<8x256xf32>
    tpu.vector_store %arg3[%c0_3, %c0_4], %3 {strides = array<i32>} : memref<8x256xf32, #tpu.memory_space<vmem>>, vector<8x256xf32>,
    return
  }
  func.func @transform_0(%arg0: i32) -> (i32, i32) {
    %c0_i32 = arith.constant 0 : i32
    %c0_i32_0 = arith.constant 0 : i32
    return %arg0, %c0_i32 : i32, i32
  }
  func.func @transform_1(%arg0: i32) -> (i32, i32) {
    %c0_i32 = arith.constant 0 : i32
    %c0_i32_0 = arith.constant 0 : i32
    %c0_i32_1 = arith.constant 0 : i32
    return %c0_i32, %c0_i32_0 : i32, i32
  }
  func.func @transform_2(%arg0: i32) -> (i32, i32) {
    %c0_i32 = arith.constant 0 : i32
    %c0_i32_0 = arith.constant 0 : i32
    return %arg0, %c0_i32 : i32, i32
  }
}

</mosaic_0001>

<bundles_post_ra>
// kernel: tpu_custom_call.1
= control target key start
LH: loop header
LB: loop body
LE: loop exit
PB: predicated region body
PF: predicated region fallthrough
CT: control target
= control target key end

     0   :  { %7 = vsyncpa [#allocation3], 0  ;;  %s129_s0 = inlined_call_operand.hbm [shape: f32[8,256], index: 0, kind: input, shape index: {}, may-alias: {0,2}]   ;;  %s130_s1 = inlined_call_operand.vmem [shape: f32[1,256], index: 1, kind: input, shape index: {}]   ;;  %s131_s2 = inlined_call_operand.hbm [shape: f32[8,256], index: 2, kind: output, shape index: {}, may-alias: {0,2}]  }
   0x1   :  { %8 = vsyncpa [#allocation4], 0  ;;  %s103_s9 = smov [#allocation2]  }
   0x2   :  { %s15_s10 = sshll.u32 %s103_s9, 4  ;;  %s16_s10 = int_to_ptr.vmem [resolvable:$true] %s15_s10 }
   0x3   :  { %s67_s11 = scalar_lea.vmem %s16_s10, 256  ;;  %p72_p1 = scmp.lt.s32.totalorder %s16_s10, %s16_s10 }
   0x4   :  { %p68_p0 = scmp.ne.s32.totalorder %s16_s10, %s67_s11  ;;  %p73_p2 = scmp.lt.s32.totalorder %s67_s11, %s67_s11 }
   0x6   :  { %p74_p3 = por %p73_p2, %p72_p1 }
   0x8   :  { %p75_p4 = pnand %p74_p3, %p68_p0 }
   0xa   :  { %78 = shalt.err (!%p75_p4)
}
   0xb   :  { %18 = dma.hbm_to_vmem [thread:$0]  %s129_s0, 256, %s16_s10, [#allocation3]  }
   0xc   :  { %99 = dma.done.wait [#allocation3], 256  }
   0xd   :  { %100 = vsyncadd [#allocation3], 4294967040  ;;  %v28_v0 = vlaneseq  ;;  %v24_v4 = vld [vmem:[#allocation2] sm:$0xff]  ;;  %v25_v6 = vld [vmem:[#allocation2 + $0x8] sm:$0xff]  ;;  %s104_s16 = smov [#allocation5]  }
   0xe   :  { %v26_v5 = vld [vmem:[%s130_s1] sm:$0x3]  ;;  %s48_s17 = sshll.u32 %s104_s16, 4  ;;  %s49_s17 = int_to_ptr.vmem [resolvable:$true] %s48_s17 }
   0xf   :  { %v29_v1 = vshrl.u32 %v28_v0, 7  ;;  %s79_s0 = scalar_lea.vmem %s49_s17, 256  ;;  %p84_p6 = scmp.lt.s32.totalorder %s49_s17, %s49_s17 }
  0x10   :  { %p80_p5 = scmp.ne.s32.totalorder %s49_s17, %s79_s0  ;;  %p85_p7 = scmp.lt.s32.totalorder %s79_s0, %s79_s0 }
  0x11   :  { %v30_v2 = vsub.s32 0, %v29_v1  ;;  %v34_v3 = vsub.s32 1, %v29_v1 }
  0x12   :  { %p86_p8 = por %p85_p7, %p84_p6 }
  0x13   :  { %v31_v7 = vrot.slane %v26_v5, %v30_v2  ;;  %v35_v8 = vrot.slane %v26_v5, %v34_v3 }
  0x14   :  { %p87_p9 = pnand %p86_p8, %p80_p5 }
  0x15   :  { %v38_v9 = vadd.f32 %v31_v7, %v24_v4  ;;  %v39_v10 = vadd.f32 %v35_v8, %v25_v6 }
  0x17   :  { %40 = vst [vmem:[#allocation5] sm:$0xff] %v38_v9  ;;  %41 = vst [vmem:[#allocation5 + $0x8] sm:$0xff] %v39_v10 }
  0x18   :  { %90 = shalt.err (!%p87_p9)
}
  0x19   :  { %51 = dma.vmem_to_hbm [thread:$0]  %s49_s17, 256, %s131_s2, [#allocation4]  }
  0x1a   :  { %101 = dma.done.wait [#allocation4], 256  }
  0x1b   :  { %102 = vsyncadd [#allocation4], 4294967040 }
  0x1c   :  { %55 = vsyncpa [#allocation3], 1 }
  0x1d   :  { %56 = vsyncpa [#allocation4], 1 }

</bundles_post_ra>
